<compile_context>
chip_gen: v5e
topology: v5e:2x2
jax: 0.10.0
libtpu: 0.0.40
codegen_flags: <defaults>
</compile_context>

<pallas_src>
import jax
import jax.numpy as jnp
from jax.experimental import pallas as pl
from jax.experimental.pallas import tpu as pltpu


def _round_up(x, m):
    return ((x + m - 1) // m) * m


def make_attr_adapter_kernel(num_layers, dims, W, B, Np, relu, eps=1e-5):
    """Ref ordering: control [B, C_pad] (col C is the constant-1 bias column),
    attr [Np, W], wh_cat [C_pad, L*W], wa_stack [L, W, W],
    vec_stack [L, 8, W] (rows: ba | gamma | beta | zeros), out [B*Np, W]."""
    R = B * Np

    def kernel(control_ref, attr_ref, wh_ref, wa_ref, vec_ref, out_ref):
        control = control_ref[...]                       # [B, C_pad] f32
        attr = attr_ref[...]                             # [Np, W] zero-padded

        # Every hyper-net gate (bias folded via the constant-1 control column)
        # in one MXU push: [B, L*W]; replicate per-batch rows to per-row gates
        # (row r = b*Np + n).
        hw_all = jnp.dot(control, wh_ref[...],
                         preferred_element_type=jnp.float32)          # [B, L*W]
        gates = jnp.repeat(hw_all, Np, axis=0)                        # [R, L*W]

        x = None                                                      # [R, W]
        for i in range(num_layers):
            # Per-layer loads keep the live weight set to a single [W, W] tile.
            Wa = wa_ref[i]                                            # [W, W]
            layer_vecs = vec_ref[i]                                   # [8, W]
            ba = layer_vecs[0:1, :]                                   # [1, W]
            if i == 0:
                # attr rows are identical across the batch before the first
                # gating multiply: do the [Np, W] matmul once, replicate along
                # the leading (sublane) dim to B*Np rows.
                base = jnp.dot(attr, Wa,
                               preferred_element_type=jnp.float32) + ba
                x = jnp.broadcast_to(base[None], (B, Np, W)).reshape(R, W)
            else:
                x = jnp.dot(x, Wa, preferred_element_type=jnp.float32) + ba
            x = x * gates[:, i * W:(i + 1) * W]          # per-batch gating

            if i < num_layers - 1:
                gamma = layer_vecs[1:2, :]                # [1, W]
                beta = layer_vecs[2:3, :]                 # [1, W]
                inv_d = 1.0 / float(dims[i])
                # One-pass LayerNorm over the true feature width dims[i];
                # padded lanes of x are exactly zero here (see invariant),
                # so full-width sums are valid.
                # NOTE: E[x^2]-mean^2 can lose precision if |mean| >> std.
                s1 = jnp.sum(x, axis=-1, keepdims=True)
                s2 = jnp.sum(x * x, axis=-1, keepdims=True)
                mean = s1 * inv_d
                var = s2 * inv_d - mean * mean
                scale = jax.lax.rsqrt(var + eps) * gamma   # gamma folded in
                x = x * scale + (beta - mean * scale)      # normalize + affine
                x = jnp.maximum(x, 0.0)                    # ReLU
                # TODO(synk): nn.Dropout() (p=0.5) is identity at inference;
                # training-mode dropout is not implemented here.

        if relu:
            x = jnp.maximum(x, 0.0)

        # Lane-dense store of the full padded width; slicing to d_last happens
        # in the wrapper.
        out_ref[...] = x.astype(out_ref.dtype)

    return kernel


def pack_attr_adapter(attr_emb, params, ctrl_dim):
    """Pads & stacks the parameter arrays into dense lane-aligned slabs.
    Call once at parameter-load time and reuse across forward calls."""
    f32 = jnp.float32
    N, input_dim = attr_emb.shape
    L = len(params)
    dims = [int(p["Wa"].shape[1]) for p in params]
    W = max(128, _round_up(max([input_dim] + dims), 128))   # lane-pad to 128
    Np = _round_up(N, 8)                                    # sublane-pad rows
    C_pad = _round_up(ctrl_dim + 1, 128)                    # +1 bias column

    attr_pad = jnp.zeros((Np, W), f32).at[:N, :input_dim].set(attr_emb.astype(f32))
    wh_cat = jnp.zeros((C_pad, L * W), f32)
    wa_stack = jnp.zeros((L, W, W), f32)
    vec_stack = jnp.zeros((L, 8, W), f32)    # rows: ba | gamma | beta | zeros
    for i, p in enumerate(params):
        d = dims[i]
        d_in = input_dim if i == 0 else dims[i - 1]
        wh_cat = wh_cat.at[:ctrl_dim, i * W:i * W + d].set(p["Wh"].astype(f32))
        # bh folded into the gate matmul via the constant-1 control column.
        wh_cat = wh_cat.at[ctrl_dim, i * W:i * W + d].set(p["bh"].astype(f32))
        wa_stack = wa_stack.at[i, :d_in, :d].set(p["Wa"].astype(f32))
        vec_stack = vec_stack.at[i, 0, :d].set(p["ba"].astype(f32))
        if i < L - 1:
            vec_stack = vec_stack.at[i, 1, :d].set(p["gamma"].astype(f32))
            vec_stack = vec_stack.at[i, 2, :d].set(p["beta"].astype(f32))

    return dict(attr_pad=attr_pad, wh_cat=wh_cat, wa_stack=wa_stack,
                vec_stack=vec_stack, dims=tuple(dims), W=W, Np=Np, N=N,
                C=ctrl_dim, C_pad=C_pad, L=L)


def attr_adapter_forward(control_signal, packed, relu=True):
    """Returns [B, N_attr, d_last] float32."""
    B, C = control_signal.shape
    assert C == packed["C"]
    W, Np, N, L = packed["W"], packed["Np"], packed["N"], packed["L"]
    C_pad = packed["C_pad"]
    dims = packed["dims"]
    d_last = dims[-1]
    R = B * Np
    LW = L * W

    # Pad control and append the constant-1 bias column (folds bh into wh_cat).
    ctrl_pad = jnp.zeros((B, C_pad), jnp.float32)
    ctrl_pad = ctrl_pad.at[:, :C].set(control_signal.astype(jnp.float32))
    ctrl_pad = ctrl_pad.at[:, C].set(1.0)

    kernel = make_attr_adapter_kernel(L, dims, W, B, Np, relu)
    vmem = pl.BlockSpec(memory_space=pltpu.MemorySpace.VMEM)

    flops = (2 * B * C_pad * LW              # hyper-net gates (one wide matmul)
             + 2 * Np * W * W                # shared layer-0 adapter matmul
             + 2 * (L - 1) * R * W * W       # remaining adapter matmuls
             + 10 * L * R * W)               # gating + LayerNorm/ReLU elementwise
    transcendentals = (L - 1) * R            # one rsqrt per row per hidden layer
    bytes_accessed = 4 * (B * C_pad + Np * W + C_pad * LW
                          + L * W * W + L * 8 * W + R * W)

    out_flat = pl.pallas_call(
        kernel,
        out_shape=jax.ShapeDtypeStruct((R, W), jnp.float32),   # lane-dense
        in_specs=[vmem] * 5,
        out_specs=vmem,
        cost_estimate=pl.CostEstimate(flops=flops,
                                      transcendentals=transcendentals,
                                      bytes_accessed=bytes_accessed),
    )(ctrl_pad, packed["attr_pad"], packed["wh_cat"],
      packed["wa_stack"], packed["vec_stack"])

    # Slice away row / lane padding outside the kernel.
    return out_flat.reshape(B, Np, W)[:, :N, :d_last]


def attr_adapter_reference(control_signal, attr_emb, params, relu=True, eps=1e-5):
    """Pure-JAX reference mirroring the PyTorch forward (eval mode)."""
    B = control_signal.shape[0]
    x = jnp.broadcast_to(attr_emb[None], (B,) + attr_emb.shape)
    num_layers = len(params)
    for i, p in enumerate(params):
        hw = control_signal @ p["Wh"] + p["bh"]              # [B, d]
        x = x @ p["Wa"] + p["ba"]                            # [B, N, d]
        x = x * hw[:, None, :]
        if i < num_layers - 1:
            mean = jnp.mean(x, axis=-1, keepdims=True)
            var = jnp.mean((x - mean) ** 2, axis=-1, keepdims=True)
            x = (x - mean) / jnp.sqrt(var + eps)
            x = x * p["gamma"] + p["beta"]
            x = jnp.maximum(x, 0.0)
    if relu:
        x = jnp.maximum(x, 0.0)
    return x


def init_params(key, ctrl_dim, input_dim, hypernet_struct):
    """Deterministic synthetic init of HyperNet + AdapterLayer weights."""
    params = []
    incoming = input_dim
    keys = jax.random.split(key, 4 * len(hypernet_struct))
    num_layers = len(hypernet_struct)
    for i, (name, (h_in, h_out)) in enumerate(hypernet_struct.items()):
        assert h_in == ctrl_dim, "hypernet input dim must match control signal dim"
        k0, k1, k2, k3 = keys[4 * i:4 * i + 4]
        p = {
            "Wh": jax.random.normal(k0, (h_in, h_out), jnp.float32) * 0.1,
            "bh": jax.random.normal(k1, (h_out,), jnp.float32) * 0.05,
            "Wa": jax.random.normal(k2, (incoming, h_out), jnp.float32) * 0.1,
            "ba": jax.random.normal(k3, (h_out,), jnp.float32) * 0.05,
        }
        if i < num_layers - 1:
            p["gamma"] = jnp.ones((h_out,), jnp.float32)   # nn.LayerNorm default init
            p["beta"] = jnp.zeros((h_out,), jnp.float32)
        incoming = h_out
        params.append(p)
    return params


if __name__ == "__main__":
    # Small config consistent with the module:
    #   control_signal: [B=2, C_ctrl=32], attr_emb: [N_attr=8, input_dim=32]
    #   hypernet_struct: two generators, both mapping 32 -> 32
    B, C_CTRL, N_ATTR, INPUT_DIM = 2, 32, 8, 32
    hypernet_struct = {"layer0": (C_CTRL, 32), "layer1": (C_CTRL, 32)}

    key = jax.random.PRNGKey(0)
    k_ctrl, k_attr, k_params = jax.random.split(key, 3)

    control_signal = jax.random.normal(k_ctrl, (B, C_CTRL), jnp.float32)
    attr_emb = jax.random.normal(k_attr, (N_ATTR, INPUT_DIM), jnp.float32)
    params = init_params(k_params, C_CTRL, INPUT_DIM, hypernet_struct)

    # Pack once (cacheable at parameter-load time), then run the kernel.
    packed = pack_attr_adapter(attr_emb, params, C_CTRL)
    out = attr_adapter_forward(control_signal, packed, relu=True)
    out = jax.block_until_ready(out)

    ref = attr_adapter_reference(control_signal, attr_emb, params, relu=True)
    assert out.shape == (B, N_ATTR, 32)
    assert jnp.allclose(out, ref, atol=1e-4, rtol=1e-3), "mismatch vs JAX reference"

    print("KERNEL_OK")
</pallas_src>

<mosaic_0001>
module attributes {stable_mosaic.version = 11 : i64} {
  func.func @kernel(%arg0: memref<2x128xf32, #tpu.memory_space<vmem>>, %arg1: memref<8x128xf32, #tpu.memory_space<vmem>>, %arg2: memref<128x256xf32, #tpu.memory_space<vmem>>, %arg3: memref<2x128x128xf32, #tpu.memory_space<vmem>>, %arg4: memref<2x8x128xf32, #tpu.memory_space<vmem>>, %arg5: memref<16x128xf32, #tpu.memory_space<vmem>>) attributes {dimension_semantics = [], scalar_prefetch = 0 : i64, scratch_operands = 0 : i64, tpu.core_type = #tpu.core_type<tc>} {
    %c0 = arith.constant 0 : index
    %c0_0 = arith.constant 0 : index
    %0 = vector.load %arg0[%c0, %c0_0] : memref<2x128xf32, #tpu.memory_space<vmem>>, vector<2x128xf32>
    %c0_1 = arith.constant 0 : index
    %c0_2 = arith.constant 0 : index
    %1 = vector.load %arg1[%c0_1, %c0_2] : memref<8x128xf32, #tpu.memory_space<vmem>>, vector<8x128xf32>
    %c0_3 = arith.constant 0 : index
    %c0_4 = arith.constant 0 : index
    %2 = vector.load %arg2[%c0_3, %c0_4] : memref<128x256xf32, #tpu.memory_space<vmem>>, vector<128x256xf32>
    %cst = arith.constant dense<0.000000e+00> : vector<2x256xf32>
    %3 = tpu.matmul %0, %2, %cst {dimension_numbers = #tpu.dot_dimension_numbers<[1], [0], [0], [1], [0, 0, 1, 1], [], []>} : vector<2x128xf32>, vector<128x256xf32>, vector<2x256xf32> -> vector<2x256xf32>
    %4 = vector.shape_cast %3 : vector<2x256xf32> to vector<2x1x256xf32>
    %5 = vector.broadcast %4 : vector<2x1x256xf32> to vector<2x8x256xf32>
    %6 = vector.shape_cast %5 : vector<2x8x256xf32> to vector<16x256xf32>
    %c0_5 = arith.constant 0 : index
    %c0_6 = arith.constant 0 : index
    %c0_7 = arith.constant 0 : index
    %7 = vector.load %arg3[%c0_5, %c0_6, %c0_7] : memref<2x128x128xf32, #tpu.memory_space<vmem>>, vector<1x128x128xf32>
    %8 = vector.shape_cast %7 : vector<1x128x128xf32> to vector<128x128xf32>
    %c0_8 = arith.constant 0 : index
    %c0_9 = arith.constant 0 : index
    %c0_10 = arith.constant 0 : index
    %9 = vector.load %arg4[%c0_8, %c0_9, %c0_10] : memref<2x8x128xf32, #tpu.memory_space<vmem>>, vector<1x8x128xf32>
    %10 = vector.shape_cast %9 : vector<1x8x128xf32> to vector<8x128xf32>
    %11 = vector.extract_strided_slice %10 {offsets = [0, 0], sizes = [1, 128], strides = [1, 1]} : vector<8x128xf32> to vector<1x128xf32>
    %cst_11 = arith.constant dense<0.000000e+00> : vector<8x128xf32>
    %12 = tpu.matmul %1, %8, %cst_11 {dimension_numbers = #tpu.dot_dimension_numbers<[1], [0], [0], [1], [0, 0, 1, 1], [], []>} : vector<8x128xf32>, vector<128x128xf32>, vector<8x128xf32> -> vector<8x128xf32>
    %13 = vector.broadcast %11 : vector<1x128xf32> to vector<8x128xf32>
    %14 = arith.addf %12, %13 : vector<8x128xf32>
    %15 = vector.shape_cast %14 : vector<8x128xf32> to vector<1x8x128xf32>
    %16 = vector.shape_cast %15 : vector<1x8x128xf32> to vector<1x8x128xf32>
    %17 = vector.broadcast %16 : vector<1x8x128xf32> to vector<2x8x128xf32>
    %18 = vector.shape_cast %17 : vector<2x8x128xf32> to vector<16x128xf32>
    %19 = vector.extract_strided_slice %6 {offsets = [0, 0], sizes = [16, 128], strides = [1, 1]} : vector<16x256xf32> to vector<16x128xf32>
    %20 = arith.mulf %18, %19 : vector<16x128xf32>
    %21 = vector.extract_strided_slice %10 {offsets = [1, 0], sizes = [1, 128], strides = [1, 1]} : vector<8x128xf32> to vector<1x128xf32>
    %22 = vector.extract_strided_slice %10 {offsets = [2, 0], sizes = [1, 128], strides = [1, 1]} : vector<8x128xf32> to vector<1x128xf32>
    %cst_12 = arith.constant dense<0.000000e+00> : vector<16xf32>
    %23 = vector.multi_reduction <add>, %20, %cst_12 [1] : vector<16x128xf32> to vector<16xf32>
    %24 = vector.shape_cast %23 : vector<16xf32> to vector<16x1xf32>
    %25 = arith.mulf %20, %20 : vector<16x128xf32>
    %cst_13 = arith.constant dense<0.000000e+00> : vector<16xf32>
    %26 = vector.multi_reduction <add>, %25, %cst_13 [1] : vector<16x128xf32> to vector<16xf32>
    %27 = vector.shape_cast %26 : vector<16xf32> to vector<16x1xf32>
    %cst_14 = arith.constant 3.125000e-02 : f32
    %28 = vector.broadcast %cst_14 : f32 to vector<16x1xf32>
    %29 = arith.mulf %24, %28 : vector<16x1xf32>
    %cst_15 = arith.constant 3.125000e-02 : f32
    %30 = vector.broadcast %cst_15 : f32 to vector<16x1xf32>
    %31 = arith.mulf %27, %30 : vector<16x1xf32>
    %32 = arith.mulf %29, %29 : vector<16x1xf32>
    %33 = arith.subf %31, %32 : vector<16x1xf32>
    %cst_16 = arith.constant 9.99999974E-6 : f32
    %34 = vector.broadcast %cst_16 : f32 to vector<16x1xf32>
    %35 = arith.addf %33, %34 : vector<16x1xf32>
    %36 = math.rsqrt %35 : vector<16x1xf32>
    %37 = vector.broadcast %36 : vector<16x1xf32> to vector<16x128xf32>
    %38 = vector.broadcast %21 : vector<1x128xf32> to vector<16x128xf32>
    %39 = arith.mulf %37, %38 : vector<16x128xf32>
    %40 = arith.mulf %20, %39 : vector<16x128xf32>
    %41 = vector.broadcast %29 : vector<16x1xf32> to vector<16x128xf32>
    %42 = arith.mulf %41, %39 : vector<16x128xf32>
    %43 = vector.broadcast %22 : vector<1x128xf32> to vector<16x128xf32>
    %44 = arith.subf %43, %42 : vector<16x128xf32>
    %45 = arith.addf %40, %44 : vector<16x128xf32>
    %cst_17 = arith.constant 0.000000e+00 : f32
    %46 = vector.broadcast %cst_17 : f32 to vector<16x128xf32>
    %47 = arith.maximumf %45, %46 : vector<16x128xf32>
    %c1 = arith.constant 1 : index
    %c0_18 = arith.constant 0 : index
    %c0_19 = arith.constant 0 : index
    %48 = vector.load %arg3[%c1, %c0_18, %c0_19] : memref<2x128x128xf32, #tpu.memory_space<vmem>>, vector<1x128x128xf32>
    %49 = vector.shape_cast %48 : vector<1x128x128xf32> to vector<128x128xf32>
    %c1_20 = arith.constant 1 : index
    %c0_21 = arith.constant 0 : index
    %c0_22 = arith.constant 0 : index
    %50 = vector.load %arg4[%c1_20, %c0_21, %c0_22] : memref<2x8x128xf32, #tpu.memory_space<vmem>>, vector<1x8x128xf32>
    %51 = vector.shape_cast %50 : vector<1x8x128xf32> to vector<8x128xf32>
    %52 = vector.extract_strided_slice %51 {offsets = [0, 0], sizes = [1, 128], strides = [1, 1]} : vector<8x128xf32> to vector<1x128xf32>
    %cst_23 = arith.constant dense<0.000000e+00> : vector<16x128xf32>
    %53 = tpu.matmul %47, %49, %cst_23 {dimension_numbers = #tpu.dot_dimension_numbers<[1], [0], [0], [1], [0, 0, 1, 1], [], []>} : vector<16x128xf32>, vector<128x128xf32>, vector<16x128xf32> -> vector<16x128xf32>
    %54 = vector.broadcast %52 : vector<1x128xf32> to vector<16x128xf32>
    %55 = arith.addf %53, %54 : vector<16x128xf32>
    %56 = vector.extract_strided_slice %6 {offsets = [0, 128], sizes = [16, 128], strides = [1, 1]} : vector<16x256xf32> to vector<16x128xf32>
    %57 = arith.mulf %55, %56 : vector<16x128xf32>
    %cst_24 = arith.constant 0.000000e+00 : f32
    %58 = vector.broadcast %cst_24 : f32 to vector<16x128xf32>
    %59 = arith.maximumf %57, %58 : vector<16x128xf32>
    %c0_25 = arith.constant 0 : index
    %c0_26 = arith.constant 0 : index
    %60 = vector.load %arg5[%c0_25, %c0_26] : memref<16x128xf32, #tpu.memory_space<vmem>>, vector<16x128xf32>
    tpu.vector_store %arg5[%c0_25, %c0_26], %59 {strides = array<i32>} : memref<16x128xf32, #tpu.memory_space<vmem>>, vector<16x128xf32>,
    return
  }
}

</mosaic_0001>

<bundles_post_ra>
// kernel: tpu_custom_call.1
= control target key start
LH: loop header
LB: loop body
LE: loop exit
PB: predicated region body
PF: predicated region fallthrough
CT: control target
= control target key end

     0   :  { %10 = vsyncpa [#allocation3], 0  ;;  %s610_s0 = inlined_call_operand.hbm [shape: f32[2,128], index: 0, kind: input, shape index: {}]   ;;  %s611_s1 = inlined_call_operand.hbm [shape: f32[8,128], index: 1, kind: input, shape index: {}]   ;;  %s612_s2 = inlined_call_operand.hbm [shape: f32[128,256], index: 2, kind: input, shape index: {}]   ;;  %s613_s3 = inlined_call_operand.hbm [shape: f32[2,128,128], index: 3, kind: input, shape index: {}]   ;;  %s614_s4 = inlined_call_operand.hbm [shape: f32[2,8,128], index: 4, kind: input, shape index: {}]   ;;  %s615_s5 = inlined_call_operand.hbm [shape: f32[16,128], index: 5, kind: output, shape index: {}]  }
   0x1   :  { %11 = vsyncpa [#allocation6], 0 }
   0x2   :  { %12 = vsyncpa [#allocation9], 0  ;;  %s30_s20 = sshll.u32 %s611_s1, 4  ;;  %s31_s20 = int_to_ptr.hbm [resolvable:$true] %s30_s20 }
   0x3   :  { %13 = vsyncpa [#allocation4], 0  ;;  %s515_s21 = smov [#allocation5]   ;;  %s53_s25 = sshll.u32 %s613_s3, 4  ;;  %s54_s25 = int_to_ptr.hbm [resolvable:$true] %s53_s25 }
   0x4   :  { %s32_s22 = sshll.u32 %s515_s21, 4  ;;  %s516_s26 = smov [#allocation8]   ;;  %s33_s22 = int_to_ptr.vmem [resolvable:$true] %s32_s22 }
   0x5   :  { %35 = dma.hbm_to_vmem [thread:$0]  %s31_s20, 128, %s33_s22, [#allocation6]  }
   0x6   :  { %s55_s27 = sshll.u32 %s516_s26, 4  ;;  %s517_s28 = smov 128   ;;  %s56_s27 = int_to_ptr.vmem [resolvable:$true] %s55_s27 }
   0x7   :  { %s518_s29 = smov 8   ;;  %s19_s6 = sshll.u32 %s610_s0, 4  ;;  %s20_s6 = int_to_ptr.hbm [resolvable:$true] %s19_s6 }
   0x8   :  { %61 = dma.hbm_to_vmem [thread:$0]  %s54_s25, 4096, %s56_s27, [#allocation9], %s517_s28, %s517_s28, %s518_s29  }
   0x9   :  { %s519_s7 = smov [#allocation2]   ;;  %s40_s10 = sshll.u32 %s612_s2, 4  ;;  %s41_s10 = int_to_ptr.hbm [resolvable:$true] %s40_s10 }
   0xa   :  { %s21_s8 = sshll.u32 %s519_s7, 4  ;;  %s520_s11 = smov [#allocation7]   ;;  %s22_s8 = int_to_ptr.vmem [resolvable:$true] %s21_s8 }
   0xb   :  { %24 = dma.hbm_to_vmem [thread:$0]  %s20_s6, 32, %s22_s8, [#allocation3]  }
   0xc   :  { %s42_s12 = sshll.u32 %s520_s11, 4  ;;  %s521_s13 = smov 256   ;;  %s43_s12 = int_to_ptr.vmem [resolvable:$true] %s42_s12 }
   0xd   :  { %s522_s14 = smov 16   ;;  %s66_s0 = sshll.u32 %s614_s4, 4  ;;  %s67_s0 = int_to_ptr.hbm [resolvable:$true] %s66_s0 }
   0xe   :  { %48 = dma.hbm_to_vmem [thread:$0]  %s41_s10, 4096, %s43_s12, [#allocation6], %s521_s13, %s521_s13, %s522_s14  }
   0xf   :  { %s523_s17 = smov [#allocation10]  }
  0x10   :  { %s68_s18 = sshll.u32 %s523_s17, 4  ;;  %s69_s18 = int_to_ptr.vmem [resolvable:$true] %s68_s18 }
  0x11   :  { %74 = dma.hbm_to_vmem [thread:$0]  %s67_s0, 256, %s69_s18, [#allocation9], %s517_s28, %s517_s28, %s518_s29  }
  0x12   :  { %507 = dma.done.wait [#allocation3], 32  }
  0x13   :  { %508 = vsyncadd [#allocation3], 4294967264 }
  0x14   :  { %509 = dma.done.wait [#allocation6], 4224  }
  0x15   :  { %510 = vsyncadd [#allocation6], 4294963072 }
  0x16   :  { %511 = dma.done.wait [#allocation9], 4352  }
  0x17   :  { %512 = vsyncadd [#allocation9], 4294962944  ;;  %v200_v0 = vld [vmem:[#allocation8 + $0x78] sm:$0xff]  ;;  %v199_v2 = vld [vmem:[#allocation8 + $0x70] sm:$0xff]  ;;  %vm172_vm0 = vcmask 1040384   ;;  %vm174_vm1 = vcmask 1041409  }
  0x18   :  { %v128_v1 = vld [vmem:[#allocation7 + $0xf8] sm:$0xff]  ;;  %203 = vmatpush.msra.mxu2 %v200_v0  ;;  %v127_v3 = vld [vmem:[#allocation7 + $0xf0] sm:$0xff]  ;;  %v126_v4 = vld [vmem:[#allocation7 + $0xe8] sm:$0xff]  ;;  %s524_s2 = smov [#allocation11]   ;;  %s334_s21 = sshll.u32 %s615_s5, 4  ;;  %s335_s21 = int_to_ptr.hbm [resolvable:$true] %s334_s21 }
  0x19   :  { %149 = vmatpush.msra.mxu1 %v128_v1  ;;  %129 = vmatpush.msra.mxu0 %v127_v3  ;;  %v198_v5 = vld [vmem:[#allocation8 + $0x68] sm:$0xff]  ;;  %v125_v6 = vld [vmem:[#allocation7 + $0xe0] sm:$0xff]  ;;  %v124_v7 = vld [vmem:[#allocation7 + $0xd8] sm:$0xff]  ;;  %s332_s4 = sshll.u32 %s524_s2, 4  ;;  %s333_s4 = int_to_ptr.vmem [resolvable:$true] %s332_s4 }
  0x1a   :  { %204 = vmatpush.msra.mxu2 %v199_v2  ;;  %v123_v8 = vld [vmem:[#allocation7 + $0xd0] sm:$0xff]  ;;  %v197_v9 = vld [vmem:[#allocation8 + $0x60] sm:$0xff]  ;;  %v122_v10 = vld [vmem:[#allocation7 + $0xc8] sm:$0xff] }
  0x1b   :  { %150 = vmatpush.msra.mxu1 %v126_v4  ;;  %130 = vmatpush.msra.mxu0 %v125_v6  ;;  %v121_v11 = vld [vmem:[#allocation7 + $0xc0] sm:$0xff]  ;;  %v196_v12 = vld [vmem:[#allocation8 + $0x58] sm:$0xff]  ;;  %v119_v14 = vld [vmem:[#allocation7 + $0xb0] sm:$0xff] }
  0x1c   :  { %205 = vmatpush.msra.mxu2 %v198_v5  ;;  %v120_v13 = vld [vmem:[#allocation7 + $0xb8] sm:$0xff]  ;;  %v195_v15 = vld [vmem:[#allocation8 + $0x50] sm:$0xff]  ;;  %v118_v16 = vld [vmem:[#allocation7 + $0xa8] sm:$0xff] }
  0x1d   :  { %151 = vmatpush.msra.mxu1 %v124_v7  ;;  %131 = vmatpush.msra.mxu0 %v123_v8  ;;  %v117_v17 = vld [vmem:[#allocation7 + $0xa0] sm:$0xff]  ;;  %v194_v18 = vld [vmem:[#allocation8 + $0x48] sm:$0xff]  ;;  %v116_v19 = vld [vmem:[#allocation7 + $0x98] sm:$0xff] }
  0x1e   :  { %206 = vmatpush.msra.mxu2 %v197_v9  ;;  %v115_v20 = vld [vmem:[#allocation7 + $0x90] sm:$0xff]  ;;  %v193_v21 = vld [vmem:[#allocation8 + $0x40] sm:$0xff]  ;;  %v114_v22 = vld [vmem:[#allocation7 + $0x88] sm:$0xff] }
  0x1f   :  { %152 = vmatpush.msra.mxu1 %v122_v10  ;;  %132 = vmatpush.msra.mxu0 %v121_v11  ;;  %v113_v23 = vld [vmem:[#allocation7 + $0x80] sm:$0xff]  ;;  %v192_v24 = vld [vmem:[#allocation8 + $0x38] sm:$0xff]  ;;  %v111_v26 = vld [vmem:[#allocation7 + $0x70] sm:$0xff] }
  0x20   :  { %207 = vmatpush.msra.mxu2 %v196_v12  ;;  %v112_v25 = vld [vmem:[#allocation7 + $0x78] sm:$0xff]  ;;  %v191_v27 = vld [vmem:[#allocation8 + $0x30] sm:$0xff]  ;;  %v110_v28 = vld [vmem:[#allocation7 + $0x68] sm:$0xff] }
  0x21   :  { %153 = vmatpush.msra.mxu1 %v120_v13  ;;  %133 = vmatpush.msra.mxu0 %v119_v14  ;;  %v109_v29 = vld [vmem:[#allocation7 + $0x60] sm:$0xff]  ;;  %v190_v30 = vld [vmem:[#allocation8 + $0x28] sm:$0xff]  ;;  %v108_v31 = vld [vmem:[#allocation7 + $0x58] sm:$0xff] }
  0x22   :  { %208 = vmatpush.msra.mxu2 %v195_v15  ;;  %v107_v32 = vld [vmem:[#allocation7 + $0x50] sm:$0xff]  ;;  %v189_v33 = vld [vmem:[#allocation8 + $0x20] sm:$0xff]  ;;  %v106_v34 = vld [vmem:[#allocation7 + $0x48] sm:$0xff] }
  0x23   :  { %154 = vmatpush.msra.mxu1 %v118_v16  ;;  %134 = vmatpush.msra.mxu0 %v117_v17  ;;  %v105_v35 = vld [vmem:[#allocation7 + $0x40] sm:$0xff]  ;;  %v188_v36 = vld [vmem:[#allocation8 + $0x18] sm:$0xff]  ;;  %v103_v38 = vld [vmem:[#allocation7 + $0x30] sm:$0xff] }
  0x24   :  { %209 = vmatpush.msra.mxu2 %v194_v18  ;;  %v104_v37 = vld [vmem:[#allocation7 + $0x38] sm:$0xff]  ;;  %v187_v39 = vld [vmem:[#allocation8 + $0x10] sm:$0xff]  ;;  %v102_v40 = vld [vmem:[#allocation7 + $0x28] sm:$0xff] }
  0x25   :  { %155 = vmatpush.msra.mxu1 %v116_v19  ;;  %135 = vmatpush.msra.mxu0 %v115_v20  ;;  %v101_v41 = vld [vmem:[#allocation7 + $0x20] sm:$0xff]  ;;  %v186_v42 = vld [vmem:[#allocation8 + $0x8] sm:$0xff]  ;;  %v100_v43 = vld [vmem:[#allocation7 + $0x18] sm:$0xff] }
  0x26   :  { %210 = vmatpush.msra.mxu2 %v193_v21  ;;  %v99_v44 = vld [vmem:[#allocation7 + $0x10] sm:$0xff]  ;;  %v185_v45 = vld [vmem:[#allocation8] sm:$0xff]  ;;  %v98_v46 = vld [vmem:[#allocation7 + $0x8] sm:$0xff] }
  0x27   :  { %156 = vmatpush.msra.mxu1 %v114_v22  ;;  %136 = vmatpush.msra.mxu0 %v113_v23  ;;  %v96_v47 = vld [vmem:[#allocation5] sm:$0xff]  ;;  %v95_v48 = vld [vmem:[#allocation2] sm:$0x3]  ;;  %v97_v49 = vld [vmem:[#allocation7] sm:$0xff] }
  0x28   :  { %211 = vmatpush.msra.mxu2 %v192_v24  ;;  %v576_v51 = vld [vmem:[#allocation10] sm:$0xff]  ;;  %v295_v2 = vld [vmem:[#allocation8 + $0xf8] sm:$0xff]  ;;  %v294_v3 = vld [vmem:[#allocation8 + $0xf0] sm:$0xff] }
  0x29   :  { %157 = vmatpush.msra.mxu1 %v112_v25  ;;  %137 = vmatpush.msra.mxu0 %v111_v26  ;;  %v202_v56 = vperm.slane %v576_v51, 0  ;;  %v293_v4 = vld [vmem:[#allocation8 + $0xe8] sm:$0xff]  ;;  %v292_v5 = vld [vmem:[#allocation8 + $0xe0] sm:$0xff]  ;;  %v291_v6 = vld [vmem:[#allocation8 + $0xd8] sm:$0xff] }
  0x2a   :  { %212 = vmatpush.msra.mxu2 %v191_v27  ;;  %299 = vmatpush.msra.mxu3 %v295_v2  ;;  %v290_v7 = vld [vmem:[#allocation8 + $0xd0] sm:$0xff]  ;;  %v289_v8 = vld [vmem:[#allocation8 + $0xc8] sm:$0xff]  ;;  %v288_v9 = vld [vmem:[#allocation8 + $0xc0] sm:$0xff] }
  0x2b   :  { %158 = vmatpush.msra.mxu1 %v110_v28  ;;  %138 = vmatpush.msra.mxu0 %v109_v29  ;;  %v287_v10 = vld [vmem:[#allocation8 + $0xb8] sm:$0xff]  ;;  %v286_v11 = vld [vmem:[#allocation8 + $0xb0] sm:$0xff]  ;;  %v285_v12 = vld [vmem:[#allocation8 + $0xa8] sm:$0xff] }
  0x2c   :  { %213 = vmatpush.msra.mxu2 %v190_v30  ;;  %300 = vmatpush.msra.mxu3 %v294_v3  ;;  %v284_v15 = vld [vmem:[#allocation8 + $0xa0] sm:$0xff]  ;;  %v283_v16 = vld [vmem:[#allocation8 + $0x98] sm:$0xff]  ;;  %v282_v17 = vld [vmem:[#allocation8 + $0x90] sm:$0xff] }
  0x2d   :  { %159 = vmatpush.msra.mxu1 %v108_v31  ;;  %139 = vmatpush.msra.mxu0 %v107_v32  ;;  %v281_v20 = vld [vmem:[#allocation8 + $0x88] sm:$0xff]  ;;  %v280_v23 = vld [vmem:[#allocation8 + $0x80] sm:$0xff] }
  0x2e   :  { %214 = vmatpush.msra.mxu2 %v189_v33  ;;  %301 = vmatpush.msra.mxu3 %v293_v4  ;;  %v297_v2 = vld [vmem:[#allocation10 + $0x8] sm:$0xff] }
  0x2f   :  { %160 = vmatpush.msra.mxu1 %v106_v34  ;;  %140 = vmatpush.msra.mxu0 %v105_v35  ;;  %v298_v3 = vperm.slane %v297_v2, 0 }
  0x30   :  { %215 = vmatpush.msra.mxu2 %v188_v36  ;;  %302 = vmatpush.msra.mxu3 %v292_v5 }
  0x31   :  { %161 = vmatpush.msra.mxu1 %v104_v37  ;;  %141 = vmatpush.msra.mxu0 %v103_v38 }
  0x32   :  { %216 = vmatpush.msra.mxu2 %v187_v39  ;;  %303 = vmatpush.msra.mxu3 %v291_v6 }
  0x33   :  { %162 = vmatpush.msra.mxu1 %v102_v40  ;;  %142 = vmatpush.msra.mxu0 %v101_v41 }
  0x34   :  { %217 = vmatpush.msra.mxu2 %v186_v42  ;;  %304 = vmatpush.msra.mxu3 %v290_v7  ;;  %v265_v42 = vperm.slane %v576_v51, 1 }
  0x35   :  { %163 = vmatpush.msra.mxu1 %v100_v43  ;;  %143 = vmatpush.msra.mxu0 %v99_v44 }
  0x36   :  { %218 = vmatpush.msra.mxu2 %v185_v45  ;;  %305 = vmatpush.msra.mxu3 %v289_v8 }
  0x37   :  { %164 = vmatpush.msra.mxu1 %v98_v46  ;;  %219 = vmatmul.f32.vlgmr.msra.gmra.mxu2 %v96_v47 }
  0x38   :  { %165 = vmatmul.f32.vlgmr.msra.gmra.mxu1 %v95_v48  ;;  %144 = vmatpush.msra.mxu0 %v97_v49 }
  0x39   :  { %145 = vmatmul.f32.vlgmr.msra.gmra.mxu0 %v95_v48  ;;  %306 = vmatpush.msra.mxu3 %v288_v9  ;;  %v272_v48 = vperm.slane %v576_v51, 2 }
  0x3b   :  { %307 = vmatpush.msra.mxu3 %v287_v10 }
  0x3d   :  { %308 = vmatpush.msra.mxu3 %v286_v11 }
  0x3f   :  { %309 = vmatpush.msra.mxu3 %v285_v12 }
  0x41   :  { %310 = vmatpush.msra.mxu3 %v284_v15 }
  0x43   :  { %311 = vmatpush.msra.mxu3 %v283_v16 }
  0x45   :  { %312 = vmatpush.msra.mxu3 %v282_v17 }
  0x47   :  { %313 = vmatpush.msra.mxu3 %v281_v20 }
  0x49   :  { %314 = vmatpush.msra.mxu3 %v280_v23 }
  0xb5   :  { %v166_v50 = vpop.f32.mrf.mxu1 }
  0xb6   :  { %v171_v52 = vrot.slane %v166_v50, 7  ;;  %v146_v53 = vpop.f32.mrf.mxu0 }
  0xb8   :  { %v578_v54 = vsel %vm172_vm0, %v146_v53, %v171_v52  ;;  %v580_v55 = vsel %vm174_vm1, %v146_v53, %v171_v52 }
  0xb9   :  { %v176_v57 = vrot.slane %v580_v55, 1  ;;  %v177_v58 = vperm.slane %v578_v54, 0  ;;  %v178_v51 = vperm.slane %v578_v54, 1 }
  0xba   :  { %v220_v60 = vpop.f32.mrf.mxu2 }
  0xbb   :  { %v179_v59 = vperm.slane %v176_v57, 0  ;;  %v221_v61 = vadd.f32 %v220_v60, %v202_v56  ;;  %v180_v8 = vperm.slane %v176_v57, 1 }
  0xbd   :  { %v587_v62 = vmul.f32 %v221_v61, %v177_v58  ;;  %v589_v63 = vmul.f32 %v221_v61, %v179_v59 }
  0xbf   :  { %227 = vadd.xlane.f32.xlu1 %v589_v63  ;;  %225 = vadd.xlane.f32.xlu0 %v587_v62  ;;  %v230_v0 = vmul.f32 %v589_v63, %v589_v63  ;;  %v229_v1 = vmul.f32 %v587_v62, %v587_v62 }
  0xc7   :  { %233 = vadd.xlane.f32.xlu1 %v230_v0  ;;  %231 = vadd.xlane.f32.xlu0 %v229_v1 }
 0x132   :  { %v228_v13 = vpop.xlane.xlu1 %227  ;;  %v226_v14 = vpop.xlane.xlu0 %225 }
 0x133   :  { %v236_v18 = vmul.f32 0.03125, %v228_v13  ;;  %v235_v19 = vmul.f32 0.03125, %v226_v14 }
 0x135   :  { %v240_v24 = vmul.f32 %v236_v18, %v236_v18  ;;  %v239_v25 = vmul.f32 %v235_v19, %v235_v19 }
 0x13a   :  { %v234_v21 = vpop.xlane.xlu1 %233  ;;  %v232_v22 = vpop.xlane.xlu0 %231 }
 0x13b   :  { %v238_v26 = vmul.f32 0.03125, %v234_v21  ;;  %v237_v27 = vmul.f32 0.03125, %v232_v22 }
 0x13d   :  { %v242_v28 = vsub.f32 %v238_v26, %v240_v24  ;;  %v241_v29 = vsub.f32 %v237_v27, %v239_v25 }
 0x13f   :  { %v244_v30 = vadd.f32 1e-05, %v242_v28  ;;  %v243_v31 = vadd.f32 1e-05, %v241_v29 }
 0x141   :  { %359 = vrsqrt.f32 %v244_v30  ;;  %vm261_vm4 = vweird.f32 %v244_v30  ;;  %vm251_vm6 = vweird.f32 %v243_v31 }
 0x142   :  { %361 = vrsqrt.f32 %v243_v31 }
 0x147   :  { %v360_v32 = vpop.eup %359 }
 0x148   :  { %v362_v33 = vpop.eup %361  ;;  %v256_v34 = vmul.f32 %v360_v32, %v244_v30  ;;  %vm262_vm2 = vweird.f32 %v360_v32 }
 0x149   :  { %v246_v35 = vmul.f32 %v362_v33, %v243_v31  ;;  %vm252_vm3 = vweird.f32 %v362_v33  ;;  %vm263_vm5 = vmor %vm261_vm4, %vm262_vm2 }
 0x14a   :  { %v257_v36 = vmul.f32 %v360_v32, %v256_v34  ;;  %vm253_vm7 = vmor %vm251_vm6, %vm252_vm3 }
 0x14b   :  { %v247_v37 = vmul.f32 %v362_v33, %v246_v35 }
 0x14c   :  { %v258_v38 = vmul.f32 0.5, %v257_v36 }
 0x14d   :  { %v248_v39 = vmul.f32 0.5, %v247_v37 }
 0x14e   :  { %v259_v40 = vsub.f32 1.5, %v258_v38 }
 0x14f   :  { %v249_v41 = vsub.f32 1.5, %v248_v39 }
 0x150   :  { %v260_v43 = vmul.f32 %v360_v32, %v259_v40 }
 0x151   :  { %v250_v44 = vmul.f32 %v362_v33, %v249_v41 }
 0x152   :  { %v264_v45 = vsel %vm263_vm5, %v360_v32, %v260_v43 }
 0x153   :  { %v254_v46 = vsel %vm253_vm7, %v362_v33, %v250_v44  ;;  %v267_v49 = vmul.f32 %v265_v42, %v264_v45 }
 0x154   :  { %v266_v47 = vmul.f32 %v265_v42, %v254_v46 }
 0x155   :  { %v271_v56 = vmul.f32 %v267_v49, %v236_v18  ;;  %v269_v61 = vmul.f32 %v267_v49, %v589_v63 }
 0x156   :  { %v270_v50 = vmul.f32 %v266_v47, %v235_v19  ;;  %v268_v52 = vmul.f32 %v266_v47, %v587_v62 }
 0x157   :  { %v274_v60 = vsub.f32 %v272_v48, %v271_v56 }
 0x158   :  { %v273_v53 = vsub.f32 %v272_v48, %v270_v50 }
 0x159   :  { %v276_v0 = vadd.f32 %v274_v60, %v269_v61 }
 0x15a   :  { %v275_v58 = vadd.f32 %v273_v53, %v268_v52 }
 0x15b   :  { %v278_v1 = vmax.f32 %v276_v0, 0.0 }
 0x15c   :  { %v277_v59 = vmax.f32 %v275_v58, 0.0 }
 0x15e   :  { %315 = vmatmul.f32.vlgmr.msra.gmra.mxu3 %v277_v59 }
 0x166   :  { %318 = vmatmul.f32.gmra.mxu3 %v278_v1 }
 0x1e1   :  { %v316_v4 = vpop.f32.mrf.mxu3 }
 0x1e2   :  { %v317_v5 = vadd.f32 %v316_v4, %v298_v3 }
 0x1e4   :  { %v322_v6 = vmul.f32 %v317_v5, %v178_v51 }
 0x1e6   :  { %v324_v7 = vmax.f32 %v322_v6, 0.0 }
 0x1e8   :  { %326 = vst [vmem:[#allocation11] sm:$0xff] %v324_v7 }
 0x1e9   :  { %v319_v62 = vpop.f32.mrf.mxu3 }
 0x1ea   :  { %v320_v9 = vadd.f32 %v319_v62, %v298_v3 }
 0x1ec   :  { %v323_v63 = vmul.f32 %v320_v9, %v180_v8 }
 0x1ee   :  { %v325_v10 = vmax.f32 %v323_v63, 0.0 }
 0x1f0   :  { %327 = vst [vmem:[#allocation11 + $0x8] sm:$0xff] %v325_v10 }
 0x1f1   :  { %340 = dma.vmem_to_hbm [thread:$0]  %s333_s4, 256, %s335_s21, [#allocation4], %s517_s28, %s517_s28, %s518_s29  }
 0x1f2   :  { %513 = dma.done.wait [#allocation4], 256  }
 0x1f3   :  { %514 = vsyncadd [#allocation4], 4294967040 }
 0x1f4   :  { %345 = vsyncpa [#allocation3], 1 }
 0x1f5   :  { %346 = vsyncpa [#allocation6], 1 }
 0x1f6   :  { %347 = vsyncpa [#allocation9], 1 }
 0x1f7   :  { %348 = vsyncpa [#allocation4], 1 }

</bundles_post_ra>
